<compile_context>
chip_gen: v6e
topology: v6e:2x2x1
jax: 0.10.0
libtpu: 0.0.40
codegen_flags: <defaults>
</compile_context>

<pallas_src>
import jax
import jax.numpy as jnp
from jax.experimental import pallas as pl
from jax.experimental.pallas import tpu as pltpu

P_DROP = 0.5
KEEP_PROB = 1.0 - P_DROP
SCALE = 1.0 / KEEP_PROB  # inverted-dropout scaling = 2.0


def dropout_kernel(x_ref, u_ref, o_ref):
    # Keep an element iff u < keep_prob (probability 1 - p); survivors are
    # scaled by 1/(1-p). Compute in f32 (fast path on all generations), cast
    # back to the output dtype on store.
    keep = u_ref[...] < jnp.float32(KEEP_PROB)                      # 1 compare
    scaled = x_ref[...].astype(jnp.float32) * jnp.float32(SCALE)    # 1 mul
    o_ref[...] = jnp.where(keep, scaled, jnp.float32(0.0)).astype(o_ref.dtype)


def _vreg_dense_shape(n):
    # Pack n elements into (8, n//8): full sublanes and a lane dim that is a
    # large multiple of 128 -> dense, unmasked vector loads/stores.
    if n % (8 * 128) == 0:
        return (8, n // 8)
    if n % 128 == 0:
        return (n // 128, 128)
    return (1, n)


def dropout_pallas(x, key):
    orig_shape = x.shape
    slab = _vreg_dense_shape(x.size)
    x2 = x.reshape(slab)
    # Per-element U[0,1) draws; the dropout decision itself happens in-kernel.
    u = jax.random.uniform(key, slab, dtype=jnp.float32)

    y2 = pl.pallas_call(
        dropout_kernel,
        out_shape=jax.ShapeDtypeStruct(slab, x.dtype),
        in_specs=[
            pl.BlockSpec(memory_space=pltpu.VMEM),  # x slab
            pl.BlockSpec(memory_space=pltpu.VMEM),  # uniform slab
        ],
        out_specs=pl.BlockSpec(memory_space=pltpu.VMEM),
    )(x2, u)
    return y2.reshape(orig_shape)


if __name__ == "__main__":
    key = jax.random.PRNGKey(0)
    kx, kmask = jax.random.split(key)
    # Same shape as the reference module's input: torch.Size([1, 4096])
    x = jax.random.normal(kx, (1, 4096), dtype=jnp.float32)

    y = dropout_pallas(x, kmask)
    y = jax.block_until_ready(y)

    # Sanity: every output element is either 0 or exactly 2*x.
    assert y.shape == x.shape
    mask = y != 0.0
    assert jnp.allclose(jnp.where(mask, y, 0.0), jnp.where(mask, 2.0 * x, 0.0),
                        rtol=1e-6, atol=1e-6)
    # Roughly half of the elements should be dropped (p = 0.5).
    drop_frac = 1.0 - float(jnp.mean(mask.astype(jnp.float32)))
    assert 0.35 < drop_frac < 0.65

    print("KERNEL_OK")
</pallas_src>

<mosaic_0001>
module attributes {stable_mosaic.version = 11 : i64} {
  func.func @dropout_kernel(%arg0: memref<8x512xf32, #tpu.memory_space<vmem>>, %arg1: memref<8x512xf32, #tpu.memory_space<vmem>>, %arg2: memref<8x512xf32, #tpu.memory_space<vmem>>) attributes {dimension_semantics = [], scalar_prefetch = 0 : i64, scratch_operands = 0 : i64, tpu.core_type = #tpu.core_type<tc>} {
    %c0 = arith.constant 0 : index
    %c0_0 = arith.constant 0 : index
    %0 = vector.load %arg1[%c0, %c0_0] : memref<8x512xf32, #tpu.memory_space<vmem>>, vector<8x512xf32>
    %cst = arith.constant 5.000000e-01 : f32
    %1 = vector.broadcast %cst : f32 to vector<8x512xf32>
    %2 = arith.cmpf olt, %0, %1 : vector<8x512xf32>
    %c0_1 = arith.constant 0 : index
    %c0_2 = arith.constant 0 : index
    %3 = vector.load %arg0[%c0_1, %c0_2] : memref<8x512xf32, #tpu.memory_space<vmem>>, vector<8x512xf32>
    %cst_3 = arith.constant 2.000000e+00 : f32
    %4 = vector.broadcast %cst_3 : f32 to vector<8x512xf32>
    %5 = arith.mulf %3, %4 : vector<8x512xf32>
    %cst_4 = arith.constant 0.000000e+00 : f32
    %6 = vector.broadcast %cst_4 : f32 to vector<8x512xf32>
    %7 = arith.select %2, %5, %6 : vector<8x512xi1>, vector<8x512xf32>
    %c0_5 = arith.constant 0 : index
    %c0_6 = arith.constant 0 : index
    %8 = vector.load %arg2[%c0_5, %c0_6] : memref<8x512xf32, #tpu.memory_space<vmem>>, vector<8x512xf32>
    tpu.vector_store %arg2[%c0_5, %c0_6], %7 {strides = array<i32>} : memref<8x512xf32, #tpu.memory_space<vmem>>, vector<8x512xf32>,
    return
  }
}

</mosaic_0001>

<bundles_post_ra>
// kernel: tpu_custom_call.1
= control target key start
LH: loop header
LB: loop body
LE: loop exit
PB: predicated region body
PF: predicated region fallthrough
CT: control target
= control target key end

     0   :  { %7 = vsyncpa [#allocation3], 0  ;;  %s172_s0 = inlined_call_operand.hbm [shape: f32[8,512], index: 0, kind: input, shape index: {}]   ;;  %s173_s1 = inlined_call_operand.hbm [shape: f32[8,512], index: 1, kind: input, shape index: {}]   ;;  %s174_s2 = inlined_call_operand.hbm [shape: f32[8,512], index: 2, kind: output, shape index: {}]  }
   0x1   :  { %8 = vsyncpa [#allocation6], 0 }
   0x2   :  { %9 = vsyncpa [#allocation4], 0  ;;  %s145_s9 = smov [#allocation2]   ;;  %s146_s11 = smov [#allocation5]  }
   0x3   :  { %s16_s10 = sshll.u32 %s145_s9, 4  ;;  %s26_s12 = sshll.u32 %s146_s11, 4  ;;  %s17_s10 = int_to_ptr.vmem [resolvable:$true] %s16_s10  ;;  %s27_s12 = int_to_ptr.vmem [resolvable:$true] %s26_s12 }
   0x4   :  { %s87_s13 = scalar_lea.vmem %s17_s10, 512  ;;  %p92_p1 = scmp.lt.s32.totalorder %s17_s10, %s17_s10 }
   0x5   :  { %p88_p0 = scmp.ne.s32.totalorder %s17_s10, %s87_s13  ;;  %p93_p2 = scmp.lt.s32.totalorder %s87_s13, %s87_s13 }
   0x7   :  { %p94_p3 = por %p93_p2, %p92_p1 }
   0x9   :  { %p95_p4 = pnand %p94_p3, %p88_p0 }
   0xb   :  { %98 = shalt.err (!%p95_p4)
}
   0xc   :  { %19 = dma.hbm_to_vmem [thread:$0]  %s172_s0, 512, %s17_s10, [#allocation3]  }
   0xd   :  { %s107_s16 = scalar_lea.vmem %s27_s12, 512  ;;  %p112_p6 = scmp.lt.s32.totalorder %s27_s12, %s27_s12 }
   0xe   :  { %p108_p5 = scmp.ne.s32.totalorder %s27_s12, %s107_s16  ;;  %p113_p7 = scmp.lt.s32.totalorder %s107_s16, %s107_s16 }
  0x10   :  { %p114_p8 = por %p113_p7, %p112_p6 }
  0x12   :  { %p115_p9 = pnand %p114_p8, %p108_p5 }
  0x14   :  { %118 = shalt.err (!%p115_p9)
}
  0x15   :  { %29 = dma.hbm_to_vmem [thread:$0]  %s173_s1, 512, %s27_s12, [#allocation6]  }
  0x16   :  { %139 = dma.done.wait [#allocation3], 512  }
  0x17   :  { %140 = vsyncadd [#allocation3], 4294966784 }
  0x18   :  { %141 = dma.done.wait [#allocation6], 512  }
  0x19   :  { %142 = vsyncadd [#allocation6], 4294966784  ;;  %v36_v0 = vld [vmem:[#allocation5] sm:$0xff]  ;;  %v37_v2 = vld [vmem:[#allocation5 + $0x8] sm:$0xff]  ;;  %s147_s19 = smov [#allocation7]  }
  0x1a   :  { %v44_v1 = vld [vmem:[#allocation2] sm:$0xff]  ;;  %s66_s0 = sshll.u32 %s147_s19, 4  ;;  %vm40_vm0 = vcmp.lt.f32.partialorder %v36_v0, 0.5  ;;  %vm41_vm1 = vcmp.lt.f32.partialorder %v37_v2, 0.5  ;;  %v45_v4 = vld [vmem:[#allocation2 + $0x8] sm:$0xff]  ;;  %v38_v5 = vld [vmem:[#allocation5 + $0x10] sm:$0xff]  ;;  %s67_s0 = int_to_ptr.vmem [resolvable:$true] %s66_s0 }
  0x1b   :  { %v48_v3 = vmul.f32 2.0, %v44_v1  ;;  %v46_v6 = vld [vmem:[#allocation2 + $0x10] sm:$0xff]  ;;  %v49_v7 = vmul.f32 2.0, %v45_v4  ;;  %vm42_vm2 = vcmp.lt.f32.partialorder %v38_v5, 0.5  ;;  %v39_v9 = vld [vmem:[#allocation5 + $0x18] sm:$0xff]  ;;  %s119_s1 = scalar_lea.vmem %s67_s0, 512  ;;  %p124_p11 = scmp.lt.s32.totalorder %s67_s0, %s67_s0 }
  0x1c   :  { %v50_v8 = vmul.f32 2.0, %v46_v6  ;;  %v47_v10 = vld [vmem:[#allocation2 + $0x18] sm:$0xff]  ;;  %vm43_vm3 = vcmp.lt.f32.partialorder %v39_v9, 0.5  ;;  %p120_p10 = scmp.ne.s32.totalorder %s67_s0, %s119_s1  ;;  %p125_p12 = scmp.lt.s32.totalorder %s119_s1, %s119_s1 }
  0x1d   :  { %v52_v11 = vsel %vm40_vm0, %v48_v3, 0.0  ;;  %v51_v12 = vmul.f32 2.0, %v47_v10  ;;  %v53_v13 = vsel %vm41_vm1, %v49_v7, 0.0 }
  0x1e   :  { %56 = vst [vmem:[#allocation7] sm:$0xff] %v52_v11  ;;  %v54_v14 = vsel %vm42_vm2, %v50_v8, 0.0  ;;  %57 = vst [vmem:[#allocation7 + $0x8] sm:$0xff] %v53_v13  ;;  %p126_p13 = por %p125_p12, %p124_p11 }
  0x1f   :  { %58 = vst [vmem:[#allocation7 + $0x10] sm:$0xff] %v54_v14  ;;  %v55_v15 = vsel %vm43_vm3, %v51_v12, 0.0 }
  0x20   :  { %59 = vst [vmem:[#allocation7 + $0x18] sm:$0xff] %v55_v15  ;;  %p127_p0 = pnand %p126_p13, %p120_p10 }
  0x22   :  { %130 = shalt.err (!%p127_p0)
}
  0x23   :  { %69 = dma.vmem_to_hbm [thread:$0]  %s67_s0, 512, %s174_s2, [#allocation4]  }
  0x24   :  { %143 = dma.done.wait [#allocation4], 512  }
  0x25   :  { %144 = vsyncadd [#allocation4], 4294966784 }
  0x26   :  { %73 = vsyncpa [#allocation3], 1 }
  0x27   :  { %74 = vsyncpa [#allocation6], 1 }
  0x28   :  { %75 = vsyncpa [#allocation4], 1 }

</bundles_post_ra>
